<compile_context>
chip_gen: v7x
topology: tpu7x:2x2x1
jax: 0.10.0
libtpu: 0.0.40
codegen_flags: <defaults>
</compile_context>

<pallas_src>
import math

import jax
import jax.numpy as jnp
from jax.experimental import pallas as pl
from jax.experimental.pallas import tpu as pltpu


# ----------------------------- Pallas kernel ------------------------------- #
def _proj_kernel(x_ref, w_ref, b_ref, o_ref):
    # x_ref: (TM, K) bf16 token tile, w_ref: (K, TN) bf16, b_ref: (1, TN) f32.
    # f32 accumulation on the MXU; bias add stays f32 (v5e has no bf16 VPU).
    acc = jnp.dot(x_ref[...], w_ref[...], preferred_element_type=jnp.float32)
    o_ref[...] = (acc + b_ref[...]).astype(o_ref.dtype)


# ------------------------------ Tiling helpers ------------------------------ #
def _round_up(x, m):
    return ((x + m - 1) // m) * m


def _vmem_budget_and_limit():
    """Per-generation VMEM sizing (v5e/v6e: 128 MiB per core, v7x: 64 MiB)."""
    phys = 64 * 1024 * 1024  # conservative default = v7x per-core VMEM
    try:
        phys = int(pltpu.get_tpu_info().vmem_capacity_bytes)
    except Exception:
        pass
    budget = int(phys * 0.40)       # target for the double-buffered tile working set
    vmem_limit = int(phys * 0.75)   # above the 32 MiB default scoped limit, below physical
    return budget, vmem_limit


def _pick_tiles(M, K, D, in_bytes, w_bytes, out_bytes, budget_bytes):
    """Pick (tile_m, tile_n) so the double-buffered working set fits the VMEM budget."""
    # d_model tile: prefer the full width per step; halve (staying a multiple of 128
    # that divides D) only if the double-buffered weight tile alone is too big
    # (e.g. d_model=4096 with a large K on v7x's smaller VMEM).
    tn = D
    while tn > 128 and tn % 256 == 0:
        fixed = 2 * (K * tn * w_bytes + tn * 4)
        if fixed <= budget_bytes // 4:
            break
        tn //= 2
    # Token tile: per-grid-step overhead is ~0.35us; 512-2048 rows reach ~85% of the
    # HBM roofline vs ~29% at 128. Cap at the (padded) token count so a tiny problem
    # runs as a single grid step.
    m_cap = min(2048, _round_up(M, 8))
    tm = 8
    while tm < m_cap:
        nxt = min(m_cap, tm * 2)
        ws = 2 * (nxt * K * in_bytes + K * tn * w_bytes + nxt * tn * out_bytes + tn * 4)
        if ws > budget_bytes:
            break
        tm = nxt
    return tm, tn


# ------------------------------ Pallas wrapper ------------------------------ #
def modality_encode_matmul(x_tokens, w, b, *, out_dtype=jnp.bfloat16):
    """x_tokens: (M, K) bf16, w: (K, D) bf16, b: (D,) f32. Returns (M, D) out_dtype."""
    M, K = x_tokens.shape
    K2, D = w.shape
    assert K == K2, (K, K2)

    if D % 128 != 0:
        # Lane-sparse output (every store would be a masked vst.msk): not worth a
        # Pallas kernel -- fall back to XLA as recommended for tiny d_model.
        return (jnp.dot(x_tokens, w, preferred_element_type=jnp.float32)
                + b.astype(jnp.float32)).astype(out_dtype)

    budget, vmem_limit = _vmem_budget_and_limit()
    in_b = jnp.dtype(x_tokens.dtype).itemsize
    w_b = jnp.dtype(w.dtype).itemsize
    out_b = jnp.dtype(out_dtype).itemsize
    tm, tn = _pick_tiles(M, K, D, in_b, w_b, out_b, budget)

    # Pad the token count to a multiple of tile_m (zero rows), slice afterwards.
    m_pad = pl.cdiv(M, tm) * tm
    if m_pad != M:
        x_tokens = jnp.pad(x_tokens, ((0, m_pad - M), (0, 0)))
    b2 = b.reshape(1, D).astype(jnp.float32)

    grid = (m_pad // tm, D // tn)
    out = pl.pallas_call(
        _proj_kernel,
        out_shape=jax.ShapeDtypeStruct((m_pad, D), out_dtype),
        grid_spec=pltpu.PrefetchScalarGridSpec(
            num_scalar_prefetch=0,
            grid=grid,
            in_specs=[
                pl.BlockSpec((tm, K), lambda i, j: (i, 0)),   # token tile (full K)
                pl.BlockSpec((K, tn), lambda i, j: (0, j)),   # weight column tile
                pl.BlockSpec((1, tn), lambda i, j: (0, j)),   # f32 bias tile
            ],
            out_specs=pl.BlockSpec((tm, tn), lambda i, j: (i, j)),
        ),
        compiler_params=pltpu.CompilerParams(
            dimension_semantics=("parallel", "parallel"),
            vmem_limit_bytes=vmem_limit,
        ),
    )(x_tokens, w, b2)

    return out[:M] if m_pad != M else out


# --------------------------- Module-equivalent ------------------------------ #
class ModalityEncoderJAX:
    """JAX/Pallas equivalent of the (concretized) ModalityEncoder.forward."""

    def __init__(self, in_channels: int, d_model: int, key, *, patch_size: int = 1,
                 param_dtype=jnp.bfloat16, out_dtype=jnp.bfloat16):
        self.d_model = d_model
        self.patch_size = patch_size
        self.in_features = in_channels * patch_size * patch_size
        self.out_dtype = out_dtype
        kw, kb = jax.random.split(key)
        bound = 1.0 / math.sqrt(self.in_features)
        # bf16 weights (native MXU input dtype); bias kept f32 for f32 accumulation.
        self.w = jax.random.uniform(
            kw, (self.in_features, d_model), jnp.float32, -bound, bound
        ).astype(param_dtype)
        self.b = jax.random.uniform(kb, (d_model,), jnp.float32, -bound, bound)

    # preprocess(): NCHW -> (B, S, p*p*C) bf16 patch tokens (plain-JAX glue).
    # patch_size=1 reproduces the previous per-pixel tokenisation exactly.
    def preprocess(self, x_nchw):
        B, C, H, W = x_nchw.shape
        p = self.patch_size
        assert H % p == 0 and W % p == 0, "spatial dims must be divisible by patch_size"
        x = x_nchw.reshape(B, C, H // p, p, W // p, p)
        x = jnp.transpose(x, (0, 2, 4, 3, 5, 1))            # (B, Hp, Wp, p, p, C)
        tokens = x.reshape(B, (H // p) * (W // p), p * p * C)
        # TODO(synk): fold this NCHW->patch transpose into the kernel (in-kernel row
        # gather / allow_input_fusion) to avoid one extra HBM round-trip of the input.
        return tokens.astype(jnp.bfloat16)

    # encode(): per-token linear projection to d_model (Pallas hot path).
    def encode(self, tokens):
        B, S, K = tokens.shape
        flat = tokens.reshape(B * S, K)
        out = modality_encode_matmul(flat, self.w, self.b, out_dtype=self.out_dtype)
        return out.reshape(B, S, self.d_model)

    # forward(): encode(preprocess(x)) -- same composition as the PyTorch base class.
    def __call__(self, inputs):
        # TODO(synk): ResourceMonitor / monitor_execution / load_checkpoint are
        # host-side bookkeeping with no kernel equivalent; forward math only.
        return self.encode(self.preprocess(inputs))


# --------------------------------- Main ------------------------------------- #
if __name__ == "__main__":
    key = jax.random.PRNGKey(0)
    k_in, k_params = jax.random.split(key)

    # Small shapes consistent with an NCHW modality input, chosen so the Pallas path
    # is MXU- and lane-friendly: K = 8*8*4 = 256 (fills v6e/v7x MXU contraction),
    # d_model = 128 (lane-dense stores), 32 tokens total -> single grid step.
    B, C, H, W = 2, 4, 32, 32
    PATCH = 8
    D_MODEL = 128

    x = jax.random.normal(k_in, (B, C, H, W), dtype=jnp.float32)

    enc = ModalityEncoderJAX(in_channels=C, d_model=D_MODEL, key=k_params,
                             patch_size=PATCH)
    y = enc(x)
    y = jax.block_until_ready(y)

    S = (H // PATCH) * (W // PATCH)
    assert y.shape == (B, S, D_MODEL), y.shape
    assert y.dtype == jnp.bfloat16, y.dtype

    # Reference check with identical numerics (bf16 inputs, f32 accumulate, bf16 out).
    tokens_f32 = enc.preprocess(x).astype(jnp.float32)
    ref = (tokens_f32 @ enc.w.astype(jnp.float32) + enc.b).astype(jnp.bfloat16)
    assert jnp.allclose(y.astype(jnp.float32), ref.astype(jnp.float32),
                        atol=2e-2, rtol=2e-2), "mismatch vs reference"

    print("KERNEL_OK")
</pallas_src>

<mosaic_0001>
module attributes {stable_mosaic.version = 11 : i64} {
  func.func @_proj_kernel(%arg0: i32, %arg1: i32, %arg2: memref<32x256xbf16, #tpu.memory_space<vmem>>, %arg3: memref<256x128xbf16, #tpu.memory_space<vmem>>, %arg4: memref<1x128xf32, #tpu.memory_space<vmem>>, %arg5: memref<32x128xbf16, #tpu.memory_space<vmem>>) attributes {dimension_semantics = [#tpu.dimension_semantics<parallel>, #tpu.dimension_semantics<parallel>], iteration_bounds = array<i64: 1, 1>, scalar_prefetch = 0 : i64, scratch_operands = 0 : i64, tpu.core_type = #tpu.core_type<tc>, window_params = [{transform_indices = @transform_0, window_bounds = array<i64: 32, 256>}, {transform_indices = @transform_1, window_bounds = array<i64: 256, 128>}, {transform_indices = @transform_2, window_bounds = array<i64: 1, 128>}, {transform_indices = @transform_3, window_bounds = array<i64: 32, 128>}]} {
    %c0 = arith.constant 0 : index
    %c0_0 = arith.constant 0 : index
    %0 = vector.load %arg2[%c0, %c0_0] : memref<32x256xbf16, #tpu.memory_space<vmem>>, vector<32x256xbf16>
    %c0_1 = arith.constant 0 : index
    %c0_2 = arith.constant 0 : index
    %1 = vector.load %arg3[%c0_1, %c0_2] : memref<256x128xbf16, #tpu.memory_space<vmem>>, vector<256x128xbf16>
    %cst = arith.constant dense<0.000000e+00> : vector<32x128xf32>
    %2 = tpu.matmul %0, %1, %cst {dimension_numbers = #tpu.dot_dimension_numbers<[1], [0], [0], [1], [0, 0, 1, 1], [], []>} : vector<32x256xbf16>, vector<256x128xbf16>, vector<32x128xf32> -> vector<32x128xf32>
    %c0_3 = arith.constant 0 : index
    %c0_4 = arith.constant 0 : index
    %3 = vector.load %arg4[%c0_3, %c0_4] : memref<1x128xf32, #tpu.memory_space<vmem>>, vector<1x128xf32>
    %4 = vector.broadcast %3 : vector<1x128xf32> to vector<32x128xf32>
    %5 = arith.addf %2, %4 : vector<32x128xf32>
    %6 = arith.truncf %5 : vector<32x128xf32> to vector<32x128xbf16>
    %c0_5 = arith.constant 0 : index
    %c0_6 = arith.constant 0 : index
    %7 = vector.load %arg5[%c0_5, %c0_6] : memref<32x128xbf16, #tpu.memory_space<vmem>>, vector<32x128xbf16>
    tpu.vector_store %arg5[%c0_5, %c0_6], %6 {strides = array<i32>} : memref<32x128xbf16, #tpu.memory_space<vmem>>, vector<32x128xbf16>,
    return
  }
  func.func @transform_0(%arg0: i32, %arg1: i32) -> (i32, i32) {
    %c0_i32 = arith.constant 0 : i32
    %c0_i32_0 = arith.constant 0 : i32
    return %arg0, %c0_i32 : i32, i32
  }
  func.func @transform_1(%arg0: i32, %arg1: i32) -> (i32, i32) {
    %c0_i32 = arith.constant 0 : i32
    %c0_i32_0 = arith.constant 0 : i32
    return %c0_i32, %arg1 : i32, i32
  }
  func.func @transform_2(%arg0: i32, %arg1: i32) -> (i32, i32) {
    %c0_i32 = arith.constant 0 : i32
    %c0_i32_0 = arith.constant 0 : i32
    return %c0_i32, %arg1 : i32, i32
  }
  func.func @transform_3(%arg0: i32, %arg1: i32) -> (i32, i32) {
    %c0_i32 = arith.constant 0 : i32
    return %arg0, %arg1 : i32, i32
  }
}

</mosaic_0001>

<bundles_post_ra>
// kernel: tpu_custom_call.1
= control target key start
LH: loop header
LB: loop body
LE: loop exit
PB: predicated region body
PF: predicated region fallthrough
CT: control target
= control target key end

     0   :  { %8 = vsyncpa [#allocation3], 0  ;;  %s547_s0 = inlined_call_operand.hbm [shape: bf16[32,256], index: 0, kind: input, shape index: {}]   ;;  %s548_s1 = inlined_call_operand.hbm [shape: bf16[256,128], index: 1, kind: input, shape index: {}]   ;;  %s549_s2 = inlined_call_operand.vmem [shape: f32[1,128], index: 2, kind: input, shape index: {}]   ;;  %s550_s3 = inlined_call_operand.hbm [shape: bf16[32,128], index: 3, kind: output, shape index: {}]  }
   0x1   :  { %9 = vsyncpa [#allocation6], 0 }
   0x2   :  { %10 = vsyncpa [#allocation4], 0  ;;  %s475_s12 = smov [#allocation2]   ;;  %s403_s16 = scalar_lea.hbm %s547_s0, 512 }
   0x3   :  { %s16_s13 = sshll.u32 %s475_s12, 4  ;;  %p404_p0 = scmp.ne.s32.totalorder %s547_s0, %s403_s16  ;;  %s17_s13 = int_to_ptr.vmem [resolvable:$true] %s16_s13 }
   0x4   :  { %p407_p1 = scmp.lt.u32.totalorder %s403_s16, %s547_s0 }
   0x6   :  { %p409_p2 = pnand %p407_p1, %p404_p0 }
   0x8   :  { %412 = shalt.err (!%p409_p2)
}
   0x9   :  { %s413_s21 = scalar_lea.vmem %s17_s13, 512  ;;  %p418_p4 = scmp.lt.s32.totalorder %s17_s13, %s17_s13 }
   0xa   :  { %p414_p3 = scmp.ne.s32.totalorder %s17_s13, %s413_s21  ;;  %p419_p5 = scmp.lt.s32.totalorder %s413_s21, %s413_s21 }
   0xc   :  { %p420_p6 = por %p419_p5, %p418_p4 }
   0xe   :  { %p421_p7 = pnand %p420_p6, %p414_p3 }
  0x10   :  { %424 = shalt.err (!%p421_p7)
}
  0x11   :  { %s476_s22 = smov 128   ;;  %s477_s23 = smov 8  }
  0x12   :  { %22 = dma.hbm_to_vmem [thread:$0]  %s547_s0, 512, %s17_s13, [#allocation3], %s476_s22, %s476_s22, %s477_s23  }
  0x13   :  { %s478_s26 = smov [#allocation5]   ;;  %s425_s30 = scalar_lea.hbm %s548_s1, 2048 }
  0x14   :  { %s28_s27 = sshll.u32 %s478_s26, 4  ;;  %p426_p8 = scmp.ne.s32.totalorder %s548_s1, %s425_s30  ;;  %s29_s27 = int_to_ptr.vmem [resolvable:$true] %s28_s27 }
  0x15   :  { %p429_p9 = scmp.lt.u32.totalorder %s425_s30, %s548_s1 }
  0x17   :  { %p431_p10 = pnand %p429_p9, %p426_p8 }
  0x19   :  { %434 = shalt.err (!%p431_p10)
}
  0x1a   :  { %s435_s8 = scalar_lea.vmem %s29_s27, 2048  ;;  %p440_p12 = scmp.lt.s32.totalorder %s29_s27, %s29_s27 }
  0x1b   :  { %p436_p11 = scmp.ne.s32.totalorder %s29_s27, %s435_s8  ;;  %p441_p13 = scmp.lt.s32.totalorder %s435_s8, %s435_s8 }
  0x1d   :  { %p442_p0 = por %p441_p13, %p440_p12 }
  0x1f   :  { %p443_p1 = pnand %p442_p0, %p436_p11 }
  0x21   :  { %446 = shalt.err (!%p443_p1)
}
  0x22   :  { %s479_s0 = smov 64   ;;  %s480_s9 = smov 4  }
  0x23   :  { %34 = dma.hbm_to_vmem [thread:$0]  %s548_s1, 2048, %s29_s27, [#allocation6], %s479_s0, %s479_s0, %s480_s9  }
  0x24   :  { %469 = dma.done.wait [#allocation3], 512  }
  0x25   :  { %470 = vsyncadd [#allocation3], 4294966784 }
  0x26   :  { %471 = dma.done.wait [#allocation6], 2048  }
  0x27   :  { %472 = vsyncadd [#allocation6], 4294965248  ;;  %v381_v0 = vld [vmem:[#allocation5 + $0x40] sm:$0xff]   ;;  %v383_v2 = vld [vmem:[#allocation5 + $0x48] sm:$0xff]   ;;  %s481_s13 = smov [#allocation7]  }
  0x28   :  { %v382_v1 = vld [vmem:[#allocation5] sm:$0xff]   ;;  %330 = vmatprep.subr.bf16.mxu0 %v381_v0  ;;  %358 = vmatprep.subr.bf16.mxu1 %v381_v0  ;;  %v384_v3 = vld [vmem:[#allocation5 + $0x8] sm:$0xff]   ;;  %v385_v4 = vld [vmem:[#allocation5 + $0x50] sm:$0xff]   ;;  %s277_s14 = sshll.u32 %s481_s13, 4  ;;  %s278_s14 = int_to_ptr.vmem [resolvable:$true] %s277_s14 }
  0x29   :  { %331 = vmatpush3.bf16.msra.mxu0 %v382_v1  ;;  %366 = vmatpush3.bf16.msra.mxu1 %v382_v1  ;;  %v386_v5 = vld [vmem:[#allocation5 + $0x10] sm:$0xff]   ;;  %v387_v6 = vld [vmem:[#allocation5 + $0x58] sm:$0xff]   ;;  %v389_v8 = vld [vmem:[#allocation5 + $0x60] sm:$0xff]   ;;  %s447_s15 = scalar_lea.vmem %s278_s14, 256  ;;  %p452_p3 = scmp.lt.s32.totalorder %s278_s14, %s278_s14 }
  0x2a   :  { %332 = vmatprep.subr.bf16.mxu0 %v383_v2  ;;  %359 = vmatprep.subr.bf16.mxu1 %v383_v2  ;;  %v388_v7 = vld [vmem:[#allocation5 + $0x18] sm:$0xff]   ;;  %v390_v9 = vld [vmem:[#allocation5 + $0x20] sm:$0xff]   ;;  %v391_v10 = vld [vmem:[#allocation5 + $0x68] sm:$0xff]   ;;  %p448_p2 = scmp.ne.s32.totalorder %s278_s14, %s447_s15  ;;  %p453_p4 = scmp.lt.s32.totalorder %s447_s15, %s447_s15 }
  0x2b   :  { %v399_v11 = vld [vmem:[#allocation2 + $0x4] ss:$8 sps:$4 sm:$0xff]   ;;  %v402_v12 = vld [vmem:[#allocation2 + $0x14] ss:$8 sps:$4 sm:$0xff]   ;;  %v397_v18 = vld [vmem:[#allocation2] ss:$8 sps:$4 sm:$0xff]  }
  0x2c   :  { %v392_v13 = vld [vmem:[#allocation5 + $0x28] sm:$0xff]   ;;  %v393_v14 = vld [vmem:[#allocation5 + $0x70] sm:$0xff]   ;;  %235 = vmatprep.mubr.bf16.mxu0 %v399_v11  ;;  %243 = vmatprep.mubr.bf16.mxu1 %v402_v12  ;;  %v395_v16 = vld [vmem:[#allocation5 + $0x78] sm:$0xff]   ;;  %p454_p5 = por %p453_p4, %p452_p3 }
  0x2d   :  { %333 = vmatpush3.bf16.msra.mxu0 %v384_v3  ;;  %367 = vmatpush3.bf16.msra.mxu1 %v384_v3  ;;  %v394_v15 = vld [vmem:[#allocation5 + $0x30] sm:$0xff]   ;;  %v396_v17 = vld [vmem:[#allocation5 + $0x38] sm:$0xff]   ;;  %v290_v28 = vld [vmem:[%s549_s2] ss:$0 sm:$0xff] }
  0x2e   :  { %334 = vmatprep.subr.bf16.mxu0 %v385_v4  ;;  %360 = vmatprep.subr.bf16.mxu1 %v385_v4  ;;  %v400_v19 = vld [vmem:[#allocation2 + $0x10] ss:$8 sps:$4 sm:$0xff]   ;;  %p455_p6 = pnand %p454_p5, %p448_p2 }
  0x31   :  { %335 = vmatpush3.bf16.msra.mxu0 %v386_v5  ;;  %368 = vmatpush3.bf16.msra.mxu1 %v386_v5 }
  0x32   :  { %336 = vmatprep.subr.bf16.mxu0 %v387_v6  ;;  %361 = vmatprep.subr.bf16.mxu1 %v387_v6 }
  0x35   :  { %337 = vmatpush3.bf16.msra.mxu0 %v388_v7  ;;  %369 = vmatpush3.bf16.msra.mxu1 %v388_v7 }
  0x36   :  { %338 = vmatprep.subr.bf16.mxu0 %v389_v8  ;;  %362 = vmatprep.subr.bf16.mxu1 %v389_v8 }
  0x39   :  { %339 = vmatpush3.bf16.msra.mxu0 %v390_v9  ;;  %370 = vmatpush3.bf16.msra.mxu1 %v390_v9 }
  0x3a   :  { %340 = vmatprep.subr.bf16.mxu0 %v391_v10  ;;  %363 = vmatprep.subr.bf16.mxu1 %v391_v10 }
  0x3d   :  { %341 = vmatpush3.bf16.msra.mxu0 %v392_v13  ;;  %371 = vmatpush3.bf16.msra.mxu1 %v392_v13 }
  0x3e   :  { %342 = vmatprep.subr.bf16.mxu0 %v393_v14  ;;  %364 = vmatprep.subr.bf16.mxu1 %v393_v14 }
  0x41   :  { %343 = vmatpush3.bf16.msra.mxu0 %v394_v15  ;;  %372 = vmatpush3.bf16.msra.mxu1 %v394_v15 }
  0x42   :  { %344 = vmatprep.subr.bf16.mxu0 %v395_v16  ;;  %365 = vmatprep.subr.bf16.mxu1 %v395_v16 }
  0x45   :  { %345 = vmatpush3.bf16.msra.mxu0 %v396_v17  ;;  %373 = vmatpush3.bf16.msra.mxu1 %v396_v17 }
  0x48   :  { %236 = vmatmul.mubr.bf16.vlgmr.msra.gmra.mrb[0].mxu0 %v397_v18  ;;  %244 = vmatmul.mubr.bf16.vlgmr.msra.gmra.mrb[0].mxu1 %v400_v19 }
 0x11b   :  { %v346_v20 = vpop.f32.mrb[0].mxu0  ;;  %v352_v21 = vpop.f32.mrb[0].mxu1 }
 0x11c   :  { %v347_v22 = vpop.f32.mrb[1].mxu0  ;;  %v353_v23 = vpop.f32.mrb[1].mxu1 }
 0x11d   :  { %v348_v24 = vadd.f32 %v347_v22, %v346_v20  ;;  %v354_v25 = vadd.f32 %v353_v23, %v352_v21  ;;  %v349_v26 = vpop.f32.mrb[2].mxu0  ;;  %v355_v27 = vpop.f32.mrb[2].mxu1 }
 0x11e   :  { %v350_v29 = vpop.f32.mrb[3].mxu0  ;;  %v356_v30 = vpop.f32.mrb[3].mxu1 }
 0x11f   :  { %v351_v31 = vadd.f32 %v350_v29, %v349_v26  ;;  %v357_v32 = vadd.f32 %v356_v30, %v355_v27  ;;  %v238_v33 = vadd.f32 %v348_v24, %v290_v28  ;;  %v246_v34 = vadd.f32 %v354_v25, %v290_v28 }
 0x121   :  { %v241_v35 = vadd.f32 %v351_v31, %v290_v28  ;;  %v249_v36 = vadd.f32 %v357_v32, %v290_v28 }
 0x123   :  { %v322_v37 = vpack.c.bf16 %v241_v35, %v238_v33  ;;  %v327_v38 = vpack.c.bf16 %v249_v36, %v246_v34 }
 0x125   :  { %323 = vst [vmem:[#allocation7] sm:$0xff] %v322_v37   ;;  %329 = vst [vmem:[#allocation7 + $0x8] sm:$0xff] %v327_v38  }
 0x126   :  { %458 = shalt.err (!%p455_p6)
}
 0x127   :  { %s459_s17 = scalar_lea.hbm %s550_s3, 256 }
 0x128   :  { %p460_p7 = scmp.ne.s32.totalorder %s550_s3, %s459_s17  ;;  %p463_p8 = scmp.lt.u32.totalorder %s459_s17, %s550_s3 }
 0x12a   :  { %p465_p9 = pnand %p463_p8, %p460_p7 }
 0x12c   :  { %468 = shalt.err (!%p465_p9)
}
 0x12d   :  { %283 = dma.vmem_to_hbm [thread:$0]  %s278_s14, 256, %s550_s3, [#allocation4], %s479_s0, %s479_s0, %s480_s9  }
 0x12e   :  { %473 = dma.done.wait [#allocation4], 256  }
 0x12f   :  { %474 = vsyncadd [#allocation4], 4294967040 }
 0x130   :  { %287 = vsyncpa [#allocation3], 1 }
 0x131   :  { %288 = vsyncpa [#allocation6], 1 }
 0x132   :  { %289 = vsyncpa [#allocation4], 1 }

</bundles_post_ra>
